<compile_context>
chip_gen: v6e
topology: v6e:2x2x1
jax: 0.10.0
libtpu: 0.0.40
codegen_flags: <defaults>
</compile_context>

<pallas_src>
import functools

import jax
import jax.numpy as jnp
import numpy as np
from jax import lax
from jax.experimental import pallas as pl
from jax.experimental.pallas import tpu as pltpu

EPS = 1e-5  # torch InstanceNorm2d default


def _resnet_kernel(x_ref, w1_ref, b1_ref, w2_ref, b2_ref, o_ref, patch_ref, *, H, W):
    # x_ref: (1, C, L); w*_ref: (C, 9C); b*_ref: (C, 1); o_ref: (1, C, L)
    # patch_ref: VMEM scratch (9C, L) = im2col buffer reused by both convs.
    _, C, L = x_ref.shape
    x = x_ref[0].astype(jnp.float32)  # (C, L), L = H*W on the lane axis

    # Reflect-border masks, computed once and reused by both convs.
    lane = lax.broadcasted_iota(jnp.int32, (C, L), 1)
    col = lane % W
    first_col = col == 0
    last_col = col == W - 1
    first_row = lane < W
    last_row = lane >= L - W

    def build_patches(a):
        # a: (C, L). Write the 9 reflect-padded taps into patch_ref, ordered
        # tap t = ky*3 + kx (ky/kx in {0,1,2} <-> dy/dx in {-1,0,+1}) to match
        # the (C_out, 9*C_in) weight layout built in the wrapper.
        # pltpu.roll follows np.roll semantics: out[l] = a[(l - shift) mod L].
        east = pltpu.roll(a, shift=L - 1, axis=1)   # value at (h, w+1)  (flat l+1)
        west = pltpu.roll(a, shift=1, axis=1)       # value at (h, w-1)  (flat l-1)
        cols = (
            jnp.where(first_col, east, west),       # dx = -1 (reflect at w == 0)
            a,                                      # dx =  0
            jnp.where(last_col, west, east),        # dx = +1 (reflect at w == W-1)
        )
        for kx in range(3):
            c = cols[kx]
            down = pltpu.roll(c, shift=L - W, axis=1)   # value at (h+1, w)
            up = pltpu.roll(c, shift=W, axis=1)         # value at (h-1, w)
            patch_ref[pl.ds((0 * 3 + kx) * C, C), :] = jnp.where(first_row, down, up)  # dy = -1
            patch_ref[pl.ds((1 * 3 + kx) * C, C), :] = c                               # dy =  0
            patch_ref[pl.ds((2 * 3 + kx) * C, C), :] = jnp.where(last_row, up, down)   # dy = +1

    def conv3x3(a, w_ref, b_ref):
        # single fused MXU matmul, K = 9*C, f32 accumulation
        # TODO(synk): optionally cast operands to bf16 (keeping f32 accumulation)
        # for higher MXU throughput; kept f32 to preserve the 1e-4 tolerance.
        build_patches(a)
        return jnp.dot(w_ref[...], patch_ref[...],
                       preferred_element_type=jnp.float32) + b_ref[...]

    def instance_norm(a):
        # single pass over the activation: sum and sum-of-squares together
        s1 = jnp.sum(a, axis=1, keepdims=True)
        s2 = jnp.sum(a * a, axis=1, keepdims=True)
        mean = s1 * (1.0 / L)
        var = s2 * (1.0 / L) - mean * mean      # biased variance (torch default)
        return (a - mean) * lax.rsqrt(var + EPS)

    y = jnp.maximum(instance_norm(conv3x3(x, w1_ref, b1_ref)), 0.0)
    y = instance_norm(conv3x3(y, w2_ref, b2_ref))
    o_ref[0] = (y + x).astype(o_ref.dtype)


def resnet_pallas(x, w1, b1, w2, b2):
    # x: (N, C, H, W) f32; w*: (C, C, 3, 3) spectrally normalized; b*: (C,)
    N, C, H, W = x.shape
    assert H >= 2 and W >= 2, "reflect padding requires H >= 2 and W >= 2"
    L = H * W

    # lane-dense activations (free, contiguous reshape in HBM)
    xf = x.reshape(N, C, L)
    # fused conv weights: (C_out, 9*C_in), tap-major (ky, kx, c_in)
    w1k = jnp.transpose(w1, (0, 2, 3, 1)).reshape(C, 9 * C)
    w2k = jnp.transpose(w2, (0, 2, 3, 1)).reshape(C, 9 * C)
    b1k = b1.reshape(C, 1)
    b2k = b2.reshape(C, 1)

    out = pl.pallas_call(
        functools.partial(_resnet_kernel, H=H, W=W),
        out_shape=jax.ShapeDtypeStruct((N, C, L), x.dtype),
        grid=(N,),
        in_specs=[
            pl.BlockSpec((1, C, L), lambda n: (n, 0, 0)),
            pl.BlockSpec((C, 9 * C), lambda n: (0, 0)),
            pl.BlockSpec((C, 1), lambda n: (0, 0)),
            pl.BlockSpec((C, 9 * C), lambda n: (0, 0)),
            pl.BlockSpec((C, 1), lambda n: (0, 0)),
        ],
        out_specs=pl.BlockSpec((1, C, L), lambda n: (n, 0, 0)),
        scratch_shapes=[pltpu.VMEM((9 * C, L), jnp.float32)],
        compiler_params=pltpu.CompilerParams(
            dimension_semantics=("parallel",)),
        # TODO(synk): for production C/H/W on v7x (64 MiB VMEM) add a row-band
        # grid axis with 1-row halo handling and set vmem_limit_bytes explicitly.
    )(xf, w1k, b1k, w2k, b2k)
    return out.reshape(N, C, H, W)


def _spectral_normalize(w):
    # torch spectral_norm divides W by its largest singular value (power-iteration
    # estimate of W reshaped to (Cout, -1)); here we use the converged value.
    w2d = w.reshape(w.shape[0], -1)
    sigma = jnp.linalg.svd(w2d, compute_uv=False)[0]
    return w / sigma


def _reference(x, w1, b1, w2, b2):
    # pure-JAX reference of the PyTorch forward
    def conv(a, w, b):
        ap = jnp.pad(a, ((0, 0), (0, 0), (1, 1), (1, 1)), mode="reflect")
        out = lax.conv_general_dilated(
            ap, w, window_strides=(1, 1), padding="VALID",
            dimension_numbers=("NCHW", "OIHW", "NCHW"))
        return out + b[None, :, None, None]

    def inorm(a):
        m = jnp.mean(a, axis=(2, 3), keepdims=True)
        v = jnp.mean((a - m) ** 2, axis=(2, 3), keepdims=True)
        return (a - m) * lax.rsqrt(v + EPS)

    y = jnp.maximum(inorm(conv(x, w1, b1)), 0.0)
    y = inorm(conv(y, w2, b2))
    return y + x


if __name__ == "__main__":
    N, C, H, W = 2, 4, 16, 16
    key = jax.random.PRNGKey(0)
    kx, kw1, kb1, kw2, kb2 = jax.random.split(key, 5)

    x = jax.random.normal(kx, (N, C, H, W), jnp.float32)

    # deterministic param init (PyTorch-style uniform bound = 1/sqrt(fan_in))
    fan_in = C * 3 * 3
    bound = 1.0 / np.sqrt(fan_in)
    w1 = jax.random.uniform(kw1, (C, C, 3, 3), jnp.float32, -bound, bound)
    b1 = jax.random.uniform(kb1, (C,), jnp.float32, -bound, bound)
    w2 = jax.random.uniform(kw2, (C, C, 3, 3), jnp.float32, -bound, bound)
    b2 = jax.random.uniform(kb2, (C,), jnp.float32, -bound, bound)

    # spectral_norm wraps only the weights (biases untouched)
    w1 = _spectral_normalize(w1)
    w2 = _spectral_normalize(w2)

    out = resnet_pallas(x, w1, b1, w2, b2)
    out = jax.block_until_ready(out)

    ref = _reference(x, w1, b1, w2, b2)
    np.testing.assert_allclose(np.asarray(out), np.asarray(ref), rtol=1e-4, atol=1e-4)

    print("KERNEL_OK")
</pallas_src>

<mosaic_0001>
module attributes {stable_mosaic.version = 11 : i64} {
  func.func @_resnet_kernel(%arg0: i32, %arg1: memref<1x4x256xf32, #tpu.memory_space<vmem>>, %arg2: memref<4x36xf32, #tpu.memory_space<vmem>>, %arg3: memref<4x1xf32, #tpu.memory_space<vmem>>, %arg4: memref<4x36xf32, #tpu.memory_space<vmem>>, %arg5: memref<4x1xf32, #tpu.memory_space<vmem>>, %arg6: memref<1x4x256xf32, #tpu.memory_space<vmem>>, %arg7: memref<36x256xf32, #tpu.memory_space<vmem>>) attributes {dimension_semantics = [#tpu.dimension_semantics<parallel>], iteration_bounds = array<i64: 2>, scalar_prefetch = 0 : i64, scratch_operands = 1 : i64, tpu.core_type = #tpu.core_type<tc>, window_params = [{transform_indices = @transform_0, window_bounds = array<i64: 1, 4, 256>}, {pipeline_mode = #tpu.pipeline_mode<synchronous>, transform_indices = @transform_1, window_bounds = array<i64: 4, 36>}, {pipeline_mode = #tpu.pipeline_mode<synchronous>, transform_indices = @transform_2, window_bounds = array<i64: 4, 1>}, {pipeline_mode = #tpu.pipeline_mode<synchronous>, transform_indices = @transform_3, window_bounds = array<i64: 4, 36>}, {pipeline_mode = #tpu.pipeline_mode<synchronous>, transform_indices = @transform_4, window_bounds = array<i64: 4, 1>}, {transform_indices = @transform_5, window_bounds = array<i64: 1, 4, 256>}]} {
    %c0 = arith.constant 0 : index
    %c0_0 = arith.constant 0 : index
    %c0_1 = arith.constant 0 : index
    %0 = vector.load %arg1[%c0, %c0_0, %c0_1] : memref<1x4x256xf32, #tpu.memory_space<vmem>>, vector<1x4x256xf32>
    %1 = vector.shape_cast %0 : vector<1x4x256xf32> to vector<4x256xf32>
    %2 = tpu.iota {dimensions = array<i32: 1>} : vector<4x256xi32>
    %c16_i32 = arith.constant 16 : i32
    %c0_i32 = arith.constant 0 : i32
    %3 = arith.cmpi eq, %c16_i32, %c0_i32 : i32
    %c1_i32 = arith.constant 1 : i32
    %4 = arith.select %3, %c1_i32, %c16_i32 : i32
    %5 = vector.broadcast %4 : i32 to vector<4x256xi32>
    %6 = arith.remsi %2, %5 : vector<4x256xi32>
    %c0_i32_2 = arith.constant 0 : i32
    %7 = vector.broadcast %c0_i32_2 : i32 to vector<4x256xi32>
    %8 = arith.cmpi ne, %6, %7 : vector<4x256xi32>
    %c0_i32_3 = arith.constant 0 : i32
    %9 = vector.broadcast %c0_i32_3 : i32 to vector<4x256xi32>
    %10 = arith.cmpi slt, %6, %9 : vector<4x256xi32>
    %c0_i32_4 = arith.constant 0 : i32
    %11 = arith.cmpi slt, %4, %c0_i32_4 : i32
    %12 = vector.broadcast %11 : i1 to vector<4x256xi1>
    %13 = vector.broadcast %12 : vector<4x256xi1> to vector<4x256xi1>
    %14 = arith.xori %10, %13 : vector<4x256xi1>
    %15 = arith.andi %14, %8 : vector<4x256xi1>
    %16 = vector.broadcast %4 : i32 to vector<4x256xi32>
    %17 = arith.addi %6, %16 : vector<4x256xi32>
    %18 = arith.select %15, %17, %6 : vector<4x256xi1>, vector<4x256xi32>
    %c0_i32_5 = arith.constant 0 : i32
    %19 = vector.broadcast %c0_i32_5 : i32 to vector<4x256xi32>
    %20 = arith.cmpi eq, %18, %19 : vector<4x256xi32>
    %c15_i32 = arith.constant 15 : i32
    %21 = vector.broadcast %c15_i32 : i32 to vector<4x256xi32>
    %22 = arith.cmpi eq, %18, %21 : vector<4x256xi32>
    %c16_i32_6 = arith.constant 16 : i32
    %23 = vector.broadcast %c16_i32_6 : i32 to vector<4x256xi32>
    %24 = arith.cmpi slt, %2, %23 : vector<4x256xi32>
    %c240_i32 = arith.constant 240 : i32
    %25 = vector.broadcast %c240_i32 : i32 to vector<4x256xi32>
    %26 = arith.cmpi sge, %2, %25 : vector<4x256xi32>
    %c255_i32 = arith.constant 255 : i32
    %27 = tpu.dynamic_rotate %1 by %c255_i32 dim 1 : vector<4x256xf32>, i32 -> vector<4x256xf32>
    %c1_i32_7 = arith.constant 1 : i32
    %28 = tpu.dynamic_rotate %1 by %c1_i32_7 dim 1 : vector<4x256xf32>, i32 -> vector<4x256xf32>
    %29 = arith.select %20, %27, %28 : vector<4x256xi1>, vector<4x256xf32>
    %30 = arith.select %22, %28, %27 : vector<4x256xi1>, vector<4x256xf32>
    %c240_i32_8 = arith.constant 240 : i32
    %31 = tpu.dynamic_rotate %29 by %c240_i32_8 dim 1 : vector<4x256xf32>, i32 -> vector<4x256xf32>
    %c16_i32_9 = arith.constant 16 : i32
    %32 = tpu.dynamic_rotate %29 by %c16_i32_9 dim 1 : vector<4x256xf32>, i32 -> vector<4x256xf32>
    %33 = arith.select %24, %31, %32 : vector<4x256xi1>, vector<4x256xf32>
    %c0_10 = arith.constant 0 : index
    %c0_11 = arith.constant 0 : index
    %34 = vector.load %arg7[%c0_10, %c0_11] : memref<36x256xf32, #tpu.memory_space<vmem>>, vector<4x256xf32>
    tpu.vector_store %arg7[%c0_10, %c0_11], %33 {strides = array<i32>} : memref<36x256xf32, #tpu.memory_space<vmem>>, vector<4x256xf32>,
    %c12 = arith.constant 12 : index
    %c0_12 = arith.constant 0 : index
    %35 = vector.load %arg7[%c12, %c0_12] : memref<36x256xf32, #tpu.memory_space<vmem>>, vector<4x256xf32>
    tpu.vector_store %arg7[%c12, %c0_12], %29 {strides = array<i32>} : memref<36x256xf32, #tpu.memory_space<vmem>>, vector<4x256xf32>,
    %36 = arith.select %26, %32, %31 : vector<4x256xi1>, vector<4x256xf32>
    %c24 = arith.constant 24 : index
    %c0_13 = arith.constant 0 : index
    %37 = vector.load %arg7[%c24, %c0_13] : memref<36x256xf32, #tpu.memory_space<vmem>>, vector<4x256xf32>
    tpu.vector_store %arg7[%c24, %c0_13], %36 {strides = array<i32>} : memref<36x256xf32, #tpu.memory_space<vmem>>, vector<4x256xf32>,
    %c240_i32_14 = arith.constant 240 : i32
    %38 = tpu.dynamic_rotate %1 by %c240_i32_14 dim 1 : vector<4x256xf32>, i32 -> vector<4x256xf32>
    %c16_i32_15 = arith.constant 16 : i32
    %39 = tpu.dynamic_rotate %1 by %c16_i32_15 dim 1 : vector<4x256xf32>, i32 -> vector<4x256xf32>
    %40 = arith.select %24, %38, %39 : vector<4x256xi1>, vector<4x256xf32>
    %c4 = arith.constant 4 : index
    %c0_16 = arith.constant 0 : index
    %41 = vector.load %arg7[%c4, %c0_16] : memref<36x256xf32, #tpu.memory_space<vmem>>, vector<4x256xf32>
    tpu.vector_store %arg7[%c4, %c0_16], %40 {strides = array<i32>} : memref<36x256xf32, #tpu.memory_space<vmem>>, vector<4x256xf32>,
    %c16 = arith.constant 16 : index
    %c0_17 = arith.constant 0 : index
    %42 = vector.load %arg7[%c16, %c0_17] : memref<36x256xf32, #tpu.memory_space<vmem>>, vector<4x256xf32>
    tpu.vector_store %arg7[%c16, %c0_17], %1 {strides = array<i32>} : memref<36x256xf32, #tpu.memory_space<vmem>>, vector<4x256xf32>,
    %43 = arith.select %26, %39, %38 : vector<4x256xi1>, vector<4x256xf32>
    %c28 = arith.constant 28 : index
    %c0_18 = arith.constant 0 : index
    %44 = vector.load %arg7[%c28, %c0_18] : memref<36x256xf32, #tpu.memory_space<vmem>>, vector<4x256xf32>
    tpu.vector_store %arg7[%c28, %c0_18], %43 {strides = array<i32>} : memref<36x256xf32, #tpu.memory_space<vmem>>, vector<4x256xf32>,
    %c240_i32_19 = arith.constant 240 : i32
    %45 = tpu.dynamic_rotate %30 by %c240_i32_19 dim 1 : vector<4x256xf32>, i32 -> vector<4x256xf32>
    %c16_i32_20 = arith.constant 16 : i32
    %46 = tpu.dynamic_rotate %30 by %c16_i32_20 dim 1 : vector<4x256xf32>, i32 -> vector<4x256xf32>
    %47 = arith.select %24, %45, %46 : vector<4x256xi1>, vector<4x256xf32>
    %c8 = arith.constant 8 : index
    %c0_21 = arith.constant 0 : index
    %48 = vector.load %arg7[%c8, %c0_21] : memref<36x256xf32, #tpu.memory_space<vmem>>, vector<4x256xf32>
    tpu.vector_store %arg7[%c8, %c0_21], %47 {strides = array<i32>} : memref<36x256xf32, #tpu.memory_space<vmem>>, vector<4x256xf32>,
    %c20 = arith.constant 20 : index
    %c0_22 = arith.constant 0 : index
    %49 = vector.load %arg7[%c20, %c0_22] : memref<36x256xf32, #tpu.memory_space<vmem>>, vector<4x256xf32>
    tpu.vector_store %arg7[%c20, %c0_22], %30 {strides = array<i32>} : memref<36x256xf32, #tpu.memory_space<vmem>>, vector<4x256xf32>,
    %50 = arith.select %26, %46, %45 : vector<4x256xi1>, vector<4x256xf32>
    %c32 = arith.constant 32 : index
    %c0_23 = arith.constant 0 : index
    %51 = vector.load %arg7[%c32, %c0_23] : memref<36x256xf32, #tpu.memory_space<vmem>>, vector<4x256xf32>
    tpu.vector_store %arg7[%c32, %c0_23], %50 {strides = array<i32>} : memref<36x256xf32, #tpu.memory_space<vmem>>, vector<4x256xf32>,
    %c0_24 = arith.constant 0 : index
    %c0_25 = arith.constant 0 : index
    %52 = vector.load %arg2[%c0_24, %c0_25] : memref<4x36xf32, #tpu.memory_space<vmem>>, vector<4x36xf32>
    %c0_26 = arith.constant 0 : index
    %c0_27 = arith.constant 0 : index
    %53 = vector.load %arg7[%c0_26, %c0_27] : memref<36x256xf32, #tpu.memory_space<vmem>>, vector<36x256xf32>
    %cst = arith.constant dense<0.000000e+00> : vector<4x256xf32>
    %54 = tpu.matmul %52, %53, %cst {dimension_numbers = #tpu.dot_dimension_numbers<[1], [0], [0], [1], [0, 0, 1, 1], [], []>} : vector<4x36xf32>, vector<36x256xf32>, vector<4x256xf32> -> vector<4x256xf32>
    %c0_28 = arith.constant 0 : index
    %c0_29 = arith.constant 0 : index
    %55 = vector.load %arg3[%c0_28, %c0_29] : memref<4x1xf32, #tpu.memory_space<vmem>>, vector<4x1xf32>
    %56 = vector.broadcast %55 : vector<4x1xf32> to vector<4x256xf32>
    %57 = arith.addf %54, %56 : vector<4x256xf32>
    %cst_30 = arith.constant dense<0.000000e+00> : vector<4xf32>
    %58 = vector.multi_reduction <add>, %57, %cst_30 [1] : vector<4x256xf32> to vector<4xf32>
    %59 = vector.shape_cast %58 : vector<4xf32> to vector<4x1xf32>
    %60 = arith.mulf %57, %57 : vector<4x256xf32>
    %cst_31 = arith.constant dense<0.000000e+00> : vector<4xf32>
    %61 = vector.multi_reduction <add>, %60, %cst_31 [1] : vector<4x256xf32> to vector<4xf32>
    %62 = vector.shape_cast %61 : vector<4xf32> to vector<4x1xf32>
    %cst_32 = arith.constant 3.906250e-03 : f32
    %63 = vector.broadcast %cst_32 : f32 to vector<4x1xf32>
    %64 = arith.mulf %59, %63 : vector<4x1xf32>
    %cst_33 = arith.constant 3.906250e-03 : f32
    %65 = vector.broadcast %cst_33 : f32 to vector<4x1xf32>
    %66 = arith.mulf %62, %65 : vector<4x1xf32>
    %67 = arith.mulf %64, %64 : vector<4x1xf32>
    %68 = arith.subf %66, %67 : vector<4x1xf32>
    %69 = vector.broadcast %64 : vector<4x1xf32> to vector<4x256xf32>
    %70 = arith.subf %57, %69 : vector<4x256xf32>
    %cst_34 = arith.constant 9.99999974E-6 : f32
    %71 = vector.broadcast %cst_34 : f32 to vector<4x1xf32>
    %72 = arith.addf %68, %71 : vector<4x1xf32>
    %73 = math.rsqrt %72 : vector<4x1xf32>
    %74 = vector.broadcast %73 : vector<4x1xf32> to vector<4x256xf32>
    %75 = arith.mulf %70, %74 : vector<4x256xf32>
    %cst_35 = arith.constant 0.000000e+00 : f32
    %76 = vector.broadcast %cst_35 : f32 to vector<4x256xf32>
    %77 = arith.maximumf %75, %76 : vector<4x256xf32>
    %c255_i32_36 = arith.constant 255 : i32
    %78 = tpu.dynamic_rotate %77 by %c255_i32_36 dim 1 : vector<4x256xf32>, i32 -> vector<4x256xf32>
    %c1_i32_37 = arith.constant 1 : i32
    %79 = tpu.dynamic_rotate %77 by %c1_i32_37 dim 1 : vector<4x256xf32>, i32 -> vector<4x256xf32>
    %80 = arith.select %20, %78, %79 : vector<4x256xi1>, vector<4x256xf32>
    %81 = arith.select %22, %79, %78 : vector<4x256xi1>, vector<4x256xf32>
    %c240_i32_38 = arith.constant 240 : i32
    %82 = tpu.dynamic_rotate %80 by %c240_i32_38 dim 1 : vector<4x256xf32>, i32 -> vector<4x256xf32>
    %c16_i32_39 = arith.constant 16 : i32
    %83 = tpu.dynamic_rotate %80 by %c16_i32_39 dim 1 : vector<4x256xf32>, i32 -> vector<4x256xf32>
    %84 = arith.select %24, %82, %83 : vector<4x256xi1>, vector<4x256xf32>
    %c0_40 = arith.constant 0 : index
    %c0_41 = arith.constant 0 : index
    %85 = vector.load %arg7[%c0_40, %c0_41] : memref<36x256xf32, #tpu.memory_space<vmem>>, vector<4x256xf32>
    tpu.vector_store %arg7[%c0_40, %c0_41], %84 {strides = array<i32>} : memref<36x256xf32, #tpu.memory_space<vmem>>, vector<4x256xf32>,
    %c12_42 = arith.constant 12 : index
    %c0_43 = arith.constant 0 : index
    %86 = vector.load %arg7[%c12_42, %c0_43] : memref<36x256xf32, #tpu.memory_space<vmem>>, vector<4x256xf32>
    tpu.vector_store %arg7[%c12_42, %c0_43], %80 {strides = array<i32>} : memref<36x256xf32, #tpu.memory_space<vmem>>, vector<4x256xf32>,
    %87 = arith.select %26, %83, %82 : vector<4x256xi1>, vector<4x256xf32>
    %c24_44 = arith.constant 24 : index
    %c0_45 = arith.constant 0 : index
    %88 = vector.load %arg7[%c24_44, %c0_45] : memref<36x256xf32, #tpu.memory_space<vmem>>, vector<4x256xf32>
    tpu.vector_store %arg7[%c24_44, %c0_45], %87 {strides = array<i32>} : memref<36x256xf32, #tpu.memory_space<vmem>>, vector<4x256xf32>,
    %c240_i32_46 = arith.constant 240 : i32
    %89 = tpu.dynamic_rotate %77 by %c240_i32_46 dim 1 : vector<4x256xf32>, i32 -> vector<4x256xf32>
    %c16_i32_47 = arith.constant 16 : i32
    %90 = tpu.dynamic_rotate %77 by %c16_i32_47 dim 1 : vector<4x256xf32>, i32 -> vector<4x256xf32>
    %91 = arith.select %24, %89, %90 : vector<4x256xi1>, vector<4x256xf32>
    %c4_48 = arith.constant 4 : index
    %c0_49 = arith.constant 0 : index
    %92 = vector.load %arg7[%c4_48, %c0_49] : memref<36x256xf32, #tpu.memory_space<vmem>>, vector<4x256xf32>
    tpu.vector_store %arg7[%c4_48, %c0_49], %91 {strides = array<i32>} : memref<36x256xf32, #tpu.memory_space<vmem>>, vector<4x256xf32>,
    %c16_50 = arith.constant 16 : index
    %c0_51 = arith.constant 0 : index
    %93 = vector.load %arg7[%c16_50, %c0_51] : memref<36x256xf32, #tpu.memory_space<vmem>>, vector<4x256xf32>
    tpu.vector_store %arg7[%c16_50, %c0_51], %77 {strides = array<i32>} : memref<36x256xf32, #tpu.memory_space<vmem>>, vector<4x256xf32>,
    %94 = arith.select %26, %90, %89 : vector<4x256xi1>, vector<4x256xf32>
    %c28_52 = arith.constant 28 : index
    %c0_53 = arith.constant 0 : index
    %95 = vector.load %arg7[%c28_52, %c0_53] : memref<36x256xf32, #tpu.memory_space<vmem>>, vector<4x256xf32>
    tpu.vector_store %arg7[%c28_52, %c0_53], %94 {strides = array<i32>} : memref<36x256xf32, #tpu.memory_space<vmem>>, vector<4x256xf32>,
    %c240_i32_54 = arith.constant 240 : i32
    %96 = tpu.dynamic_rotate %81 by %c240_i32_54 dim 1 : vector<4x256xf32>, i32 -> vector<4x256xf32>
    %c16_i32_55 = arith.constant 16 : i32
    %97 = tpu.dynamic_rotate %81 by %c16_i32_55 dim 1 : vector<4x256xf32>, i32 -> vector<4x256xf32>
    %98 = arith.select %24, %96, %97 : vector<4x256xi1>, vector<4x256xf32>
    %c8_56 = arith.constant 8 : index
    %c0_57 = arith.constant 0 : index
    %99 = vector.load %arg7[%c8_56, %c0_57] : memref<36x256xf32, #tpu.memory_space<vmem>>, vector<4x256xf32>
    tpu.vector_store %arg7[%c8_56, %c0_57], %98 {strides = array<i32>} : memref<36x256xf32, #tpu.memory_space<vmem>>, vector<4x256xf32>,
    %c20_58 = arith.constant 20 : index
    %c0_59 = arith.constant 0 : index
    %100 = vector.load %arg7[%c20_58, %c0_59] : memref<36x256xf32, #tpu.memory_space<vmem>>, vector<4x256xf32>
    tpu.vector_store %arg7[%c20_58, %c0_59], %81 {strides = array<i32>} : memref<36x256xf32, #tpu.memory_space<vmem>>, vector<4x256xf32>,
    %101 = arith.select %26, %97, %96 : vector<4x256xi1>, vector<4x256xf32>
    %c32_60 = arith.constant 32 : index
    %c0_61 = arith.constant 0 : index
    %102 = vector.load %arg7[%c32_60, %c0_61] : memref<36x256xf32, #tpu.memory_space<vmem>>, vector<4x256xf32>
    tpu.vector_store %arg7[%c32_60, %c0_61], %101 {strides = array<i32>} : memref<36x256xf32, #tpu.memory_space<vmem>>, vector<4x256xf32>,
    %c0_62 = arith.constant 0 : index
    %c0_63 = arith.constant 0 : index
    %103 = vector.load %arg4[%c0_62, %c0_63] : memref<4x36xf32, #tpu.memory_space<vmem>>, vector<4x36xf32>
    %c0_64 = arith.constant 0 : index
    %c0_65 = arith.constant 0 : index
    %104 = vector.load %arg7[%c0_64, %c0_65] : memref<36x256xf32, #tpu.memory_space<vmem>>, vector<36x256xf32>
    %cst_66 = arith.constant dense<0.000000e+00> : vector<4x256xf32>
    %105 = tpu.matmul %103, %104, %cst_66 {dimension_numbers = #tpu.dot_dimension_numbers<[1], [0], [0], [1], [0, 0, 1, 1], [], []>} : vector<4x36xf32>, vector<36x256xf32>, vector<4x256xf32> -> vector<4x256xf32>
    %c0_67 = arith.constant 0 : index
    %c0_68 = arith.constant 0 : index
    %106 = vector.load %arg5[%c0_67, %c0_68] : memref<4x1xf32, #tpu.memory_space<vmem>>, vector<4x1xf32>
    %107 = vector.broadcast %106 : vector<4x1xf32> to vector<4x256xf32>
    %108 = arith.addf %105, %107 : vector<4x256xf32>
    %cst_69 = arith.constant dense<0.000000e+00> : vector<4xf32>
    %109 = vector.multi_reduction <add>, %108, %cst_69 [1] : vector<4x256xf32> to vector<4xf32>
    %110 = vector.shape_cast %109 : vector<4xf32> to vector<4x1xf32>
    %111 = arith.mulf %108, %108 : vector<4x256xf32>
    %cst_70 = arith.constant dense<0.000000e+00> : vector<4xf32>
    %112 = vector.multi_reduction <add>, %111, %cst_70 [1] : vector<4x256xf32> to vector<4xf32>
    %113 = vector.shape_cast %112 : vector<4xf32> to vector<4x1xf32>
    %cst_71 = arith.constant 3.906250e-03 : f32
    %114 = vector.broadcast %cst_71 : f32 to vector<4x1xf32>
    %115 = arith.mulf %110, %114 : vector<4x1xf32>
    %cst_72 = arith.constant 3.906250e-03 : f32
    %116 = vector.broadcast %cst_72 : f32 to vector<4x1xf32>
    %117 = arith.mulf %113, %116 : vector<4x1xf32>
    %118 = arith.mulf %115, %115 : vector<4x1xf32>
    %119 = arith.subf %117, %118 : vector<4x1xf32>
    %120 = vector.broadcast %115 : vector<4x1xf32> to vector<4x256xf32>
    %121 = arith.subf %108, %120 : vector<4x256xf32>
    %cst_73 = arith.constant 9.99999974E-6 : f32
    %122 = vector.broadcast %cst_73 : f32 to vector<4x1xf32>
    %123 = arith.addf %119, %122 : vector<4x1xf32>
    %124 = math.rsqrt %123 : vector<4x1xf32>
    %125 = vector.broadcast %124 : vector<4x1xf32> to vector<4x256xf32>
    %126 = arith.mulf %121, %125 : vector<4x256xf32>
    %127 = arith.addf %126, %1 : vector<4x256xf32>
    %c0_74 = arith.constant 0 : index
    %c0_75 = arith.constant 0 : index
    %c0_76 = arith.constant 0 : index
    %128 = vector.load %arg6[%c0_74, %c0_75, %c0_76] : memref<1x4x256xf32, #tpu.memory_space<vmem>>, vector<1x4x256xf32>
    %129 = vector.shape_cast %128 : vector<1x4x256xf32> to vector<4x256xf32>
    %130 = vector.shape_cast %127 : vector<4x256xf32> to vector<1x4x256xf32>
    tpu.vector_store %arg6[%c0_74, %c0_75, %c0_76], %130 {strides = array<i32>} : memref<1x4x256xf32, #tpu.memory_space<vmem>>, vector<1x4x256xf32>,
    return
  }
  func.func @transform_0(%arg0: i32) -> (i32, i32, i32) {
    %c0_i32 = arith.constant 0 : i32
    %c0_i32_0 = arith.constant 0 : i32
    %c0_i32_1 = arith.constant 0 : i32
    return %arg0, %c0_i32, %c0_i32_0 : i32, i32, i32
  }
  func.func @transform_1(%arg0: i32) -> (i32, i32) {
    %c0_i32 = arith.constant 0 : i32
    %c0_i32_0 = arith.constant 0 : i32
    %c0_i32_1 = arith.constant 0 : i32
    return %c0_i32, %c0_i32_0 : i32, i32
  }
  func.func @transform_2(%arg0: i32) -> (i32, i32) {
    %c0_i32 = arith.constant 0 : i32
    %c0_i32_0 = arith.constant 0 : i32
    %c0_i32_1 = arith.constant 0 : i32
    return %c0_i32, %c0_i32_0 : i32, i32
  }
  func.func @transform_3(%arg0: i32) -> (i32, i32) {
    %c0_i32 = arith.constant 0 : i32
    %c0_i32_0 = arith.constant 0 : i32
    %c0_i32_1 = arith.constant 0 : i32
    return %c0_i32, %c0_i32_0 : i32, i32
  }
  func.func @transform_4(%arg0: i32) -> (i32, i32) {
    %c0_i32 = arith.constant 0 : i32
    %c0_i32_0 = arith.constant 0 : i32
    %c0_i32_1 = arith.constant 0 : i32
    return %c0_i32, %c0_i32_0 : i32, i32
  }
  func.func @transform_5(%arg0: i32) -> (i32, i32, i32) {
    %c0_i32 = arith.constant 0 : i32
    %c0_i32_0 = arith.constant 0 : i32
    %c0_i32_1 = arith.constant 0 : i32
    return %arg0, %c0_i32, %c0_i32_0 : i32, i32, i32
  }
}

</mosaic_0001>

<bundles_post_ra>
// kernel: tpu_custom_call.1
= control target key start
LH: loop header
LB: loop body
LE: loop exit
PB: predicated region body
PF: predicated region fallthrough
CT: control target
= control target key end

     0   :  { %10 = vsyncpa [#allocation4], 0  ;;  %s1394_s0 = inlined_call_operand.hbm [shape: f32[2,4,256], index: 0, kind: input, shape index: {}]   ;;  %s1395_s1 = inlined_call_operand.vmem [shape: f32[4,36], index: 1, kind: input, shape index: {}]   ;;  %s1396_s2 = inlined_call_operand.vmem [shape: f32[4,1], index: 2, kind: input, shape index: {}]   ;;  %s1397_s3 = inlined_call_operand.vmem [shape: f32[4,36], index: 3, kind: input, shape index: {}]   ;;  %s1398_s4 = inlined_call_operand.vmem [shape: f32[4,1], index: 4, kind: input, shape index: {}]   ;;  %s1399_s5 = inlined_call_operand.hbm [shape: f32[2,4,256], index: 5, kind: output, shape index: {}]  }
   0x1   :  { %12 = vsyncpa [#allocation4 + $0x1], 0 }
   0x2   :  { %13 = vsyncpa [#allocation5], 0 }
   0x3   :  { %15 = vsyncpa [#allocation5 + $0x1], 0  ;;  %s1041_s18 = smov 0   ;;  %s1043_s19 = smov 0  }
   0x4   :  { %s1045_s20 = smov 0   ;;  %s1047_s21 = smov 0  }
   0x5 LB: > { %s1062_s22 = sadd.s32 4294967295, %s1001_s21   ;;  %s829_s23 = sadd.s32 4294967294, %s1001_s21   ;;  %s1001_s21 = sphi %s1047_s21, %s1424_s21   ;;  %s997_s20 = sphi %s1045_s20, %s1423_s20   ;;  %s993_s19 = sphi %s1043_s19, %s1422_s19   ;;  %s989_s18 = sphi %s1041_s18, %s1421_s18  }
   0x6   : > { %s1066_s24 = sadd.s32 1, %s1001_s21   ;;  %s28_s25 = sadd.s32 1, %s997_s20 }
   0x7   : > { %s25_s26 = ssub.s32 %s1001_s21, %s1066_s24  ;;  %p35_p0 = scmp.ne.s32.totalorder %s997_s20, %s993_s19 }
   0x8   : > { %p26_p1 = scmp.eq.s32.totalorder %s25_s26, 0  ;;  %p36_p2 = scmp.eq.s32.totalorder %s1001_s21, 0 }
   0x9   : > { %p41_p3 = scmp.ne.s32.totalorder %s993_s19, %s989_s18  ;;  %p42_p4 = scmp.eq.s32.totalorder %s1062_s22, 0 }
   0xa   : > { %s1078_s27 = scalar_select %p26_p1, %s997_s20, %s28_s25  }
   0xb   : > { %p1080_p5 = por %p36_p2, %p35_p0  ;;  %p1084_p6 = por %p42_p4, %p41_p3 }
   0xc   : > { %p149_p7 = scmp.eq.s32.totalorder %s1062_s22, 1  ;;  %p155_p8 = scmp.eq.s32.totalorder %s829_s23, 1 }
   0xd   : > { %s1403_s29 = scalar_select %p1084_p6, 1, 0 }
   0xe   : > { %p863_p10 = scmp.lt.s32.totalorder %s1001_s21, 2  ;;  %p1091_p11 = por %p149_p7, %p35_p0 }
   0xf   : > { %p1095_p12 = por %p155_p8, %p41_p3  ;;  %s187_s7 = sand.u32 1, %s997_s20  }
  0x10   : > { %s1404_s30 = scalar_select %p1091_p11, 1, 0 }
  0x11   : > { %s1405_s6 = scalar_select %p1095_p12, 1, 0 }
  0x12   : > { %s849_s8 = sshll.u32 %s1001_s21, 7  ;;  %s832_s9 = sshll.u32 %s187_s7, 3 }
  0x13   : > { %s1104_s12 = scalar_lea.hbm %s1394_s0, %s849_s8  ;;  %s191_s13 = scalar_lea.vmem [#allocation3], %s832_s9 }
  0x14   : > { %s199_s14 = sshll.u32 %s191_s13, 4  ;;  %p1108_p13 = pnand %p863_p10, %p1080_p5  ;;  %s1112_s14 = int_to_ptr.vmem [resolvable:$true] %s199_s14 }
  0x15   : > { %s188_s16 = scalar_lea.sflag [#allocation4], %s187_s7  ;;  %s909_s17 = scalar_lea.hbm %s1104_s12, 128 }
  0x16   : > { %p910_p2 = scmp.ne.s32.totalorder %s1104_s12, %s909_s17  ;;  %p911_p3 = pneg %p1108_p13 }
  0x17   : > { %s914_s26 = scalar_lea.hbm %s1394_s0, 256  ;;  %p915_p5 = scmp.lt.s32.totalorder %s1104_s12, %s1394_s0 }
  0x18   : > { %p912_p4 = pnand %p911_p3, %p910_p2  ;;  %p916_p8 = scmp.lt.s32.totalorder %s914_s26, %s909_s17 }
  0x1a   : > { %p913_p7 = pneg %p912_p4  ;;  %p917_p10 = por %p916_p8, %p915_p5 }
  0x1c   : > { %p918_p9 = pnand %p917_p10, %p913_p7 }
  0x1e   : > { %921 = shalt.err (!%p918_p9)
}
  0x1f   : > { %s922_s7 = scalar_lea.vmem %s1112_s14, 128  ;;  %s1003_s9 = smov [#allocation3]  }
  0x20   : > { %p923_p0 = scmp.ne.s32.totalorder %s1112_s14, %s922_s7  ;;  %s927_s10 = sshll.u32 %s1003_s9, 4  ;;  %s928_s10 = int_to_ptr.vmem [resolvable:$false] %s927_s10 }
  0x21   : > { %s929_s11 = scalar_lea.vmem %s928_s10, 256  ;;  %p930_p4 = scmp.lt.s32.totalorder %s1112_s14, %s928_s10 }
  0x22   : > { %p925_p1 = pnand %p923_p0, %p911_p3  ;;  %p931_p12 = scmp.lt.s32.totalorder %s929_s11, %s922_s7 }
  0x24   : > { %p926_p2 = pneg %p925_p1  ;;  %p932_p11 = por %p931_p12, %p930_p4 }
  0x26   : > { %p933_p6 = pnand %p932_p11, %p926_p2 }
  0x28   : > { %936 = shalt.err (!%p933_p6)
}
  0x29   : > { %858 = dma.hbm_to_vmem [thread:$0]  (!%p1108_p13), %s1104_s12, 128, %s1112_s14, %s188_s16  }
  0x2a   : > { %p1407_p9 = scmp.lt.s32.totalorder %s1001_s21, 3  ;;  %p1408_p7 = scmp.ge.s32.totalorder %s1001_s21, 1 }
  0x2c   : > { %p205_p0 = pnand %p1408_p7, %p1407_p9 }
  0x2d   : > { %s1139_s13 = sand.u32 (!%p205_p0), 1, %s993_s19   ;;  %p1409_p6 = scmp.ne.s32.totalorder (!%p205_p0), %s1403_s29, 0 }
  0x2e   : > { %208 = sbr.rel (%p205_p0) target bundleno = 1332 (0x534), region = 40  ;;  %s836_s17 = sshll.u32 (!%p205_p0), %s1139_s13, 3 }
  0x2f   : > { %s211_s23 = scalar_lea.sflag (!%p205_p0), [#allocation4], %s1139_s13  ;;  %s214_s15 = scalar_lea.vmem (!%p205_p0), [#allocation3], %s836_s17 }
  0x33   : > { %980 = dma.done.wait (%p1409_p6), %s211_s23, 128  }
  0x34   : > { %982 = vsyncadd (%p1409_p6), %s211_s23, 4294967168  ;;  %v1149_v0 = vld [vmem:[%s214_s15] sm:$0xff]  ;;  %s1004_s12 = smov 1   ;;  %s1005_s14 = smov 127   ;;  %v242_v2 = vlaneseq  ;;  %v1008_v41 = vmov 0.0   ;;  %v1009_v43 = vmov 0  }
  0x35   : > { %287 = vrot.lane.b32.xlu1 %v1149_v0, %s1004_s12  ;;  %349 = vst [vmem:[#allocation2 + $0x8] sm:$0xf] %v1149_v0  ;;  %280 = vrot.lane.b32.xlu0 %v1149_v0, %s1005_s14  ;;  %v1158_v1 = vcombine.high %v1149_v0, %v1149_v0  ;;  %s1006_s29 = smov 112   ;;  %s1007_s16 = smov 16   ;;  %v400_v42 = vld [vmem:[%s1396_s2] sm:$0xf] }
  0x36   : > { %v1173_v3 = vand.u32 127, %v242_v2  ;;  %481 = vmatprep.mubr.f32.mxu0 %v1008_v41  ;;  %708 = vmatprep.mubr.f32.mxu1 %v1008_v41  ;;  %vm410_vm9 = vcmask 1043456   ;;  %vm406_vm10 = vcmask 293888   ;;  %s850_s23 = sshll.u32 %s1062_s22, 7  ;;  %s240_s15 = scalar_lea.vmem [#allocation6], %s836_s17 }
  0x37   : > { %350 = vst [vmem:[#allocation2 + $0x30] sm:$0xf] %v1158_v1  ;;  %903 = vset.pattern.permute.xlu0 %v1009_v43  ;;  %s745_s25 = scalar_lea.sflag [#allocation5], %s1139_s13  ;;  %p1418_p12 = scmp.ne.s32.totalorder %s1404_s30, 0 }
  0x38   : > { %v1176_v4 = vadd.s32 128, %v1173_v3  ;;  %v249_v6 = vand.u32 15, %v1173_v3  ;;  %vm291_vm0 = vcmp.lt.s32.totalorder %v1173_v3, 1  ;;  %vm284_vm1 = vcmp.lt.s32.totalorder %v1173_v3, 127  ;;  %s1010_s22 = smov [#allocation6]  }
  0x39   : > { %289 = vrot.lane.b32.xlu1 %v1158_v1, %s1004_s12  ;;  %282 = vrot.lane.b32.xlu0 %v1158_v1, %s1005_s14  ;;  %vm302_vm6 = vcmp.lt.s32.totalorder %v1173_v3, 112  ;;  %vm273_vm7 = vcmp.lt.s32.totalorder %v1173_v3, 16  ;;  %s941_s17 = sshll.u32 %s1010_s22, 4  ;;  %s942_s17 = int_to_ptr.vmem [resolvable:$false] %s941_s17 }
  0x3a   : > { %v256_v5 = vand.u32 15, %v1176_v4  ;;  %vm1186_vm3 = vcmp.eq.s32.totalorder %v249_v6, 15  ;;  %vm1194_vm5 = vcmp.eq.s32.totalorder %v249_v6, 0  ;;  %vm276_vm8 = vcmp.ge.s32.totalorder %v1176_v4, 240  ;;  %s943_s28 = scalar_lea.vmem %s942_s17, 256 }
  0x3c   : > { %vm1182_vm2 = vcmp.eq.s32.totalorder %v256_v5, 15  ;;  %vm1190_vm4 = vcmp.eq.s32.totalorder %v256_v5, 0 }
  0x3d   : > { %329 = vrot.lane.b32.xlu1 %v1158_v1, %s1006_s29  ;;  %327 = vrot.lane.b32.xlu0 %v1149_v0, %s1006_s29 }
  0x41   : > { %335 = vrot.lane.b32.xlu1 %v1158_v1, %s1007_s16  ;;  %333 = vrot.lane.b32.xlu0 %v1149_v0, %s1007_s16 }
  0xa7   : > { %v288_v7 = vpop.permute.xlu1 %287  ;;  %v281_v8 = vpop.permute.xlu0 %280 }
  0xab   : > { %v290_v13 = vpop.permute.xlu1 %289  ;;  %v283_v14 = vpop.permute.xlu0 %282 }
  0xac   : > { %v292_v15 = vsel %vm291_vm0, %v288_v7, %v290_v13  ;;  %v293_v16 = vsel %vm291_vm0, %v290_v13, %v288_v7  ;;  %v285_v17 = vsel %vm284_vm1, %v281_v8, %v283_v14  ;;  %v286_v18 = vsel %vm284_vm1, %v283_v14, %v281_v8 }
  0xad   : > { %v297_v19 = vsel %vm1182_vm2, %v292_v15, %v286_v18  ;;  %v296_v20 = vsel %vm1186_vm3, %v293_v16, %v285_v17  ;;  %v295_v21 = vsel %vm1190_vm4, %v286_v18, %v292_v15  ;;  %v294_v22 = vsel %vm1194_vm5, %v285_v17, %v293_v16  ;;  %v389_v17 = vld [vmem:[%s1395_s1] sm:$0xf] }
  0xae   : > { %363 = vrot.lane.b32.xlu1 %v297_v19, %s1006_s29  ;;  %v380_v23 = vrot.slane %v297_v19, 4  ;;  %361 = vrot.lane.b32.xlu0 %v296_v20, %s1006_s29  ;;  %v379_v24 = vrot.slane %v296_v20, 4  ;;  %v318_v25 = vrot.slane %v295_v21, 4  ;;  %v317_v26 = vrot.slane %v294_v22, 4 }
  0xaf   : > { %v330_v27 = vpop.permute.xlu1 %329  ;;  %v328_v28 = vpop.permute.xlu0 %327 }
  0xb0   : > { %384 = vst [vmem:[#allocation2 + $0x30] sm:$0xf0] %v380_v23  ;;  %383 = vst [vmem:[#allocation2 + $0x8] sm:$0xf0] %v379_v24  ;;  %v331_v29 = vsel %vm302_vm6, %v328_v28, %v330_v27  ;;  %v332_v31 = vsel %vm302_vm6, %v330_v27, %v328_v28 }
  0xb1   : > { %322 = vst [vmem:[#allocation2 + $0x10] sm:$0xf0] %v318_v25  ;;  %321 = vst [vmem:[#allocation2 + $0x18] sm:$0xf0] %v317_v26  ;;  %v355_v30 = vrot.slane %v331_v29, 4 }
  0xb2   : > { %369 = vrot.lane.b32.xlu1 %v297_v19, %s1007_s16  ;;  %367 = vrot.lane.b32.xlu0 %v296_v20, %s1007_s16 }
  0xb3   : > { %359 = vst [vmem:[#allocation2 + $0x48] sm:$0xf0] %v355_v30  ;;  %v336_v32 = vpop.permute.xlu1 %335  ;;  %v334_v33 = vpop.permute.xlu0 %333 }
  0xb4   : > { %v337_v34 = vsel %vm273_vm7, %v334_v33, %v336_v32  ;;  %v338_v35 = vsel %vm273_vm7, %v336_v32, %v334_v33 }
  0xb5   : > { %v339_v36 = vsel %vm273_vm7, %v331_v29, %v338_v35  ;;  %v344_v37 = vrot.slane %v337_v34, 4  ;;  %v352_v38 = vsel %vm276_vm8, %v337_v34, %v332_v31 }
  0xb6   : > { %300 = vrot.lane.b32.xlu1 %v295_v21, %s1006_s29  ;;  %298 = vrot.lane.b32.xlu0 %v294_v22, %s1006_s29  ;;  %v343_v39 = vrot.slane %v339_v36, 4  ;;  %v356_v40 = vrot.slane %v352_v38, 4 }
  0xb7   : > { %348 = vst [vmem:[#allocation2] sm:$0xf0] %v344_v37  ;;  %v395_v8 = vld [vmem:[#allocation2 + $0x30] sm:$0xff]  ;;  %v394_v13 = vld [vmem:[#allocation2 + $0x8] sm:$0xff] }
  0xb8   : > { %347 = vst [vmem:[#allocation2 + $0x20] sm:$0xf0] %v343_v39  ;;  %360 = vst [vmem:[#allocation2 + $0x38] sm:$0xf0] %v356_v40 }
  0xba   : > { %307 = vrot.lane.b32.xlu1 %v295_v21, %s1007_s16  ;;  %305 = vrot.lane.b32.xlu0 %v294_v22, %s1007_s16 }
  0xbe   : > { %403 = vperm.xlu0 %903, %v400_v42  }
 0x120   : > { %v364_v44 = vpop.permute.xlu1 %363  ;;  %v362_v45 = vpop.permute.xlu0 %361 }
 0x121   : > { %v365_v46 = vsel %vm302_vm6, %v362_v45, %v364_v44  ;;  %v366_v49 = vsel %vm302_vm6, %v364_v44, %v362_v45 }
 0x122   : > { %387 = vst [vmem:[#allocation2 + $0x40] sm:$0xf] %v365_v46 }
 0x124   : > { %v370_v47 = vpop.permute.xlu1 %369  ;;  %v368_v48 = vpop.permute.xlu0 %367 }
 0x125   : > { %v371_v50 = vsel %vm273_vm7, %v368_v48, %v370_v47  ;;  %v372_v51 = vsel %vm273_vm7, %v370_v47, %v368_v48 }
 0x126   : > { %v373_v52 = vsel %vm273_vm7, %v365_v46, %v372_v51  ;;  %376 = vst [vmem:[#allocation2 + $0x10] sm:$0xf] %v371_v50  ;;  %v386_v53 = vsel %vm276_vm8, %v371_v50, %v366_v49 }
 0x127   : > { %375 = vst [vmem:[#allocation2 + $0x18] sm:$0xf] %v373_v52  ;;  %388 = vst [vmem:[#allocation2 + $0x28] sm:$0xf] %v386_v53 }
 0x128   : > { %v301_v54 = vpop.permute.xlu1 %300  ;;  %v299_v55 = vpop.permute.xlu0 %298 }
 0x129   : > { %v303_v56 = vsel %vm302_vm6, %v299_v55, %v301_v54  ;;  %v304_v59 = vsel %vm302_vm6, %v301_v54, %v299_v55  ;;  %v398_v5 = vld [vmem:[#allocation2 + $0x40] sm:$0xf] }
 0x12a   : > { %325 = vst [vmem:[#allocation2 + $0x48] sm:$0xf] %v303_v56 }
 0x12c   : > { %v308_v57 = vpop.permute.xlu1 %307  ;;  %v306_v58 = vpop.permute.xlu0 %305 }
 0x12d   : > { %v309_v60 = vsel %vm273_vm7, %v306_v58, %v308_v57  ;;  %v310_v61 = vsel %vm273_vm7, %v308_v57, %v306_v58  ;;  %v393_v14 = vld [vmem:[#allocation2 + $0x10] sm:$0xff] }
 0x12e   : > { %v311_v62 = vsel %vm273_vm7, %v303_v56, %v310_v61  ;;  %314 = vst [vmem:[#allocation2] sm:$0xf] %v309_v60  ;;  %v324_v63 = vsel %vm276_vm8, %v309_v60, %v304_v59  ;;  %v399_v2 = vld [vmem:[#allocation2 + $0x28] sm:$0xf]  ;;  %v392_v15 = vld [vmem:[#allocation2 + $0x18] sm:$0xff] }
 0x12f   : > { %313 = vst [vmem:[#allocation2 + $0x20] sm:$0xf] %v311_v62  ;;  %326 = vst [vmem:[#allocation2 + $0x38] sm:$0xf] %v324_v63  ;;  %838 = vmatprep.subr.msk.mxu0 %vm410_vm9, %v399_v2 }
 0x130   : > { %839 = vmatpush1.msk.msra.mxu0 %vm410_vm9, %v398_v5 }
 0x131   : > { %v396_v7 = vld [vmem:[#allocation2 + $0x48] sm:$0xff] }
 0x135   : > { %v391_v16 = vld [vmem:[#allocation2] sm:$0xff] }
 0x136   : > { %v397_v6 = vld [vmem:[#allocation2 + $0x38] sm:$0xff]  ;;  %v390_v18 = vld [vmem:[#allocation2 + $0x20] sm:$0xff] }
 0x137   : > { %441 = vmatprep.subr.mxu0 %v397_v6 }
 0x138   : > { %442 = vmatpush1.msra.mxu0 %v396_v7 }
 0x139   : > { %443 = vmatprep.subr.mxu0 %v395_v8  ;;  %v404_v19 = vpop.permute.xlu0 %403 }
 0x13a   : > { %444 = vmatpush1.msra.mxu0 %v394_v13 }
 0x13b   : > { %445 = vmatprep.subr.mxu0 %v393_v14 }
 0x13c   : > { %446 = vmatpush1.msra.mxu0 %v392_v15 }
 0x13d   : > { %447 = vmatprep.subr.mxu0 %v391_v16  ;;  %v629_v16 = vld [vmem:[%s1398_s4] sm:$0xf] }
 0x13e   : > { %448 = vmatpush1.msra.mxu0 %v390_v18 }
 0x13f   : > { %840 = vmatmul.mubr.msk.f32.vlgmr.msra.gmra.mxu0 %vm406_vm10, %v389_v17 }
 0x1ff   : > { %v483_v20 = vpop.f32.mrf.mxu0 }
 0x200   : > { %v484_v21 = vadd.f32 %v483_v20, %v404_v19 }
 0x201   : > { %v485_v22 = vpop.f32.mrf.mxu0 }
 0x202   : > { %v486_v23 = vadd.f32 %v485_v22, %v404_v19  ;;  %v493_v24 = vmul.f32 %v484_v21, %v484_v21  ;;  %v488_v25 = vsel %vm410_vm9, %v484_v21, 0.0 }
 0x204   : > { %v489_v26 = vsel %vm410_vm9, %v486_v23, 0.0  ;;  %v494_v27 = vmul.f32 %v486_v23, %v486_v23  ;;  %v495_v29 = vsel %vm410_vm9, %v493_v24, 0.0 }
 0x205   : > { %v490_v28 = vadd.f32 %v489_v26, %v488_v25 }
 0x206   : > { %v496_v30 = vsel %vm410_vm9, %v494_v27, 0.0 }
 0x207   : > { %491 = vadd.xlane.f32.xlu1 %v490_v28  ;;  %v497_v31 = vadd.f32 %v496_v30, %v495_v29 }
 0x209   : > { %498 = vadd.xlane.f32.xlu0 %v497_v31 }
 0x290   : > { %v492_v32 = vpop.xlane.xlu1 %491 }
 0x291   : > { %v500_v33 = vmul.f32 0.00390625, %v492_v32 }
 0x292   : > { %v499_v34 = vpop.xlane.xlu0 %498 }
 0x293   : > { %v501_v35 = vmul.f32 0.00390625, %v499_v34  ;;  %v502_v36 = vmul.f32 %v500_v33, %v500_v33  ;;  %v504_v39 = vsub.f32 %v484_v21, %v500_v33  ;;  %v505_v40 = vsub.f32 %v486_v23, %v500_v33 }
 0x295   : > { %v503_v37 = vsub.f32 %v501_v35, %v502_v36 }
 0x297   : > { %v506_v38 = vadd.f32 1e-05, %v503_v37 }
 0x299   : > { %905 = vrsqrt.f32 %v506_v38 }
 0x2a6   : > { %v906_v41 = vpop.eup %905 }
 0x2a7   : > { %v509_v42 = vmul.f32 %v906_v41, %v505_v40  ;;  %v508_v43 = vmul.f32 %v906_v41, %v504_v39 }
 0x2a9   : > { %v511_v44 = vmax.f32 %v509_v42, 0.0  ;;  %v510_v45 = vmax.f32 %v508_v43, 0.0 }
 0x2ab   : > { %514 = vrot.lane.b32.xlu0 %v511_v44, %s1005_s14  ;;  %579 = vst [vmem:[#allocation2 + $0x30] sm:$0xf] %v511_v44  ;;  %512 = vrot.lane.b32.xlu1 %v510_v45, %s1005_s14  ;;  %578 = vst [vmem:[#allocation2 + $0x8] sm:$0xf] %v510_v45 }
 0x2af   : > { %556 = vrot.lane.b32.xlu0 %v510_v45, %s1006_s29  ;;  %518 = vrot.lane.b32.xlu1 %v510_v45, %s1004_s12 }
 0x2b3   : > { %562 = vrot.lane.b32.xlu0 %v510_v45, %s1007_s16  ;;  %520 = vrot.lane.b32.xlu1 %v511_v44, %s1004_s12  ;;  %s759_s12 = sshll.u32 %s240_s15, 4  ;;  %s760_s12 = int_to_ptr.vmem [resolvable:$true] %s759_s12 }
 0x2b4   : > { %s937_s26 = scalar_lea.vmem %s760_s12, 128  ;;  %p944_p3 = scmp.lt.s32.totalorder %s760_s12, %s942_s17 }
 0x2b5   : > { %p938_p11 = scmp.ne.s32.totalorder %s760_s12, %s937_s26  ;;  %p945_p5 = scmp.lt.s32.totalorder %s943_s28, %s937_s26 }
 0x2b7   : > { %558 = vrot.lane.b32.xlu1 %v511_v44, %s1006_s29  ;;  %p939_p13 = pnand %p938_p11, %p1418_p12  ;;  %p946_p8 = por %p945_p5, %p944_p3 }
 0x2b9   : > { %p940_p1 = pneg %p939_p13 }
 0x2bb   : > { %564 = vrot.lane.b32.xlu1 %v511_v44, %s1007_s16  ;;  %v618_v44 = vld [vmem:[%s1397_s3] sm:$0xf]  ;;  %p947_p10 = pnand %p946_p8, %p940_p1 }
 0x31d   : > { %v513_v46 = vpop.permute.xlu1 %512  ;;  %v515_v47 = vpop.permute.xlu0 %514 }
 0x31e   : > { %v516_v50 = vsel %vm284_vm1, %v513_v46, %v515_v47  ;;  %v517_v51 = vsel %vm284_vm1, %v515_v47, %v513_v46 }
 0x321   : > { %v519_v48 = vpop.permute.xlu1 %518  ;;  %v557_v54 = vpop.permute.xlu0 %556 }
 0x325   : > { %v521_v49 = vpop.permute.xlu1 %520  ;;  %v563_v11 = vpop.permute.xlu0 %562 }
 0x326   : > { %v522_v52 = vsel %vm291_vm0, %v519_v48, %v521_v49  ;;  %v523_v53 = vsel %vm291_vm0, %v521_v49, %v519_v48 }
 0x327   : > { %v526_v55 = vsel %vm1186_vm3, %v523_v53, %v516_v50  ;;  %v527_v56 = vsel %vm1182_vm2, %v522_v52, %v517_v51  ;;  %v524_v57 = vsel %vm1194_vm5, %v516_v50, %v523_v53  ;;  %v525_v58 = vsel %vm1190_vm4, %v517_v51, %v522_v52 }
 0x328   : > { %590 = vrot.lane.b32.xlu0 %v526_v55, %s1006_s29  ;;  %v608_v59 = vrot.slane %v526_v55, 4  ;;  %592 = vrot.lane.b32.xlu1 %v527_v56, %s1006_s29  ;;  %v609_v60 = vrot.slane %v527_v56, 4  ;;  %v546_v61 = vrot.slane %v524_v57, 4  ;;  %v547_v62 = vrot.slane %v525_v58, 4 }
 0x329   : > { %v559_v63 = vpop.permute.xlu1 %558 }
 0x32a   : > { %612 = vst [vmem:[#allocation2 + $0x8] sm:$0xf0] %v608_v59  ;;  %613 = vst [vmem:[#allocation2 + $0x30] sm:$0xf0] %v609_v60  ;;  %v560_v9 = vsel %vm302_vm6, %v557_v54, %v559_v63  ;;  %v561_v2 = vsel %vm302_vm6, %v559_v63, %v557_v54 }
 0x32b   : > { %550 = vst [vmem:[#allocation2 + $0x18] sm:$0xf0] %v546_v61  ;;  %551 = vst [vmem:[#allocation2 + $0x10] sm:$0xf0] %v547_v62  ;;  %v584_v10 = vrot.slane %v560_v9, 4 }
 0x32c   : > { %596 = vrot.lane.b32.xlu0 %v526_v55, %s1007_s16  ;;  %598 = vrot.lane.b32.xlu1 %v527_v56, %s1007_s16 }
 0x32d   : > { %588 = vst [vmem:[#allocation2 + $0x48] sm:$0xf0] %v584_v10  ;;  %v565_v12 = vpop.permute.xlu1 %564 }
 0x32e   : > { %v566_v5 = vsel %vm273_vm7, %v563_v11, %v565_v12  ;;  %v567_v6 = vsel %vm273_vm7, %v565_v12, %v563_v11 }
 0x32f   : > { %v568_v7 = vsel %vm273_vm7, %v560_v9, %v567_v6  ;;  %v573_v8 = vrot.slane %v566_v5, 4  ;;  %v581_v13 = vsel %vm276_vm8, %v566_v5, %v561_v2 }
 0x330   : > { %v572_v14 = vrot.slane %v568_v7, 4  ;;  %v585_v15 = vrot.slane %v581_v13, 4  ;;  %528 = vrot.lane.b32.xlu0 %v524_v57, %s1006_s29  ;;  %530 = vrot.lane.b32.xlu1 %v525_v58, %s1006_s29 }
 0x331   : > { %577 = vst [vmem:[#allocation2] sm:$0xf0] %v573_v8  ;;  %v624_v41 = vld [vmem:[#allocation2 + $0x30] sm:$0xff]  ;;  %v623_v3 = vld [vmem:[#allocation2 + $0x8] sm:$0xff] }
 0x332   : > { %576 = vst [vmem:[#allocation2 + $0x20] sm:$0xf0] %v572_v14  ;;  %589 = vst [vmem:[#allocation2 + $0x38] sm:$0xf0] %v585_v15 }
 0x334   : > { %534 = vrot.lane.b32.xlu0 %v524_v57, %s1007_s16  ;;  %536 = vrot.lane.b32.xlu1 %v525_v58, %s1007_s16  ;;  %s757_s16 = scalar_lea.hbm %s1399_s5, %s850_s23 }
 0x338   : > { %632 = vperm.xlu0 %903, %v629_v16  }
 0x39a   : > { %v591_v17 = vpop.permute.xlu0 %590  ;;  %v593_v18 = vpop.permute.xlu1 %592 }
 0x39b   : > { %v594_v19 = vsel %vm302_vm6, %v591_v17, %v593_v18  ;;  %v595_v22 = vsel %vm302_vm6, %v593_v18, %v591_v17 }
 0x39c   : > { %616 = vst [vmem:[#allocation2 + $0x40] sm:$0xf] %v594_v19 }
 0x39e   : > { %v597_v20 = vpop.permute.xlu0 %596  ;;  %v599_v21 = vpop.permute.xlu1 %598 }
 0x39f   : > { %v600_v23 = vsel %vm273_vm7, %v597_v20, %v599_v21  ;;  %v601_v24 = vsel %vm273_vm7, %v599_v21, %v597_v20 }
 0x3a0   : > { %v602_v25 = vsel %vm273_vm7, %v594_v19, %v601_v24  ;;  %605 = vst [vmem:[#allocation2 + $0x10] sm:$0xf] %v600_v23  ;;  %v615_v26 = vsel %vm276_vm8, %v600_v23, %v595_v22 }
 0x3a1   : > { %604 = vst [vmem:[#allocation2 + $0x18] sm:$0xf] %v602_v25  ;;  %617 = vst [vmem:[#allocation2 + $0x28] sm:$0xf] %v615_v26 }
 0x3a2   : > { %v529_v27 = vpop.permute.xlu0 %528  ;;  %v531_v28 = vpop.permute.xlu1 %530 }
 0x3a3   : > { %v532_v29 = vsel %vm302_vm6, %v529_v27, %v531_v28  ;;  %v533_v32 = vsel %vm302_vm6, %v531_v28, %v529_v27  ;;  %v627_v38 = vld [vmem:[#allocation2 + $0x40] sm:$0xf] }
 0x3a4   : > { %554 = vst [vmem:[#allocation2 + $0x48] sm:$0xf] %v532_v29 }
 0x3a6   : > { %v535_v30 = vpop.permute.xlu0 %534  ;;  %v537_v31 = vpop.permute.xlu1 %536 }
 0x3a7   : > { %v538_v33 = vsel %vm273_vm7, %v535_v30, %v537_v31  ;;  %v539_v34 = vsel %vm273_vm7, %v537_v31, %v535_v30  ;;  %v622_v42 = vld [vmem:[#allocation2 + $0x10] sm:$0xff] }
 0x3a8   : > { %v540_v35 = vsel %vm273_vm7, %v532_v29, %v539_v34  ;;  %543 = vst [vmem:[#allocation2] sm:$0xf] %v538_v33  ;;  %v553_v36 = vsel %vm276_vm8, %v538_v33, %v533_v32  ;;  %v628_v37 = vld [vmem:[#allocation2 + $0x28] sm:$0xf]  ;;  %v621_v4 = vld [vmem:[#allocation2 + $0x18] sm:$0xff] }
 0x3a9   : > { %542 = vst [vmem:[#allocation2 + $0x20] sm:$0xf] %v540_v35  ;;  %555 = vst [vmem:[#allocation2 + $0x38] sm:$0xf] %v553_v36  ;;  %841 = vmatprep.subr.msk.mxu1 %vm410_vm9, %v628_v37 }
 0x3aa   : > { %842 = vmatpush1.msk.msra.mxu1 %vm410_vm9, %v627_v38 }
 0x3ab   : > { %v625_v40 = vld [vmem:[#allocation2 + $0x48] sm:$0xff] }
 0x3af   : > { %v620_v43 = vld [vmem:[#allocation2] sm:$0xff] }
 0x3b0   : > { %v626_v39 = vld [vmem:[#allocation2 + $0x38] sm:$0xff]  ;;  %v619_v45 = vld [vmem:[#allocation2 + $0x20] sm:$0xff] }
 0x3b1   : > { %668 = vmatprep.subr.mxu1 %v626_v39 }
 0x3b2   : > { %669 = vmatpush1.msra.mxu1 %v625_v40 }
 0x3b3   : > { %670 = vmatprep.subr.mxu1 %v624_v41  ;;  %v633_v46 = vpop.permute.xlu0 %632 }
 0x3b4   : > { %671 = vmatpush1.msra.mxu1 %v623_v3 }
 0x3b5   : > { %672 = vmatprep.subr.mxu1 %v622_v42 }
 0x3b6   : > { %673 = vmatpush1.msra.mxu1 %v621_v4 }
 0x3b7   : > { %674 = vmatprep.subr.mxu1 %v620_v43 }
 0x3b8   : > { %675 = vmatpush1.msra.mxu1 %v619_v45 }
 0x3b9   : > { %843 = vmatmul.mubr.msk.f32.vlgmr.msra.gmra.mxu1 %vm406_vm10, %v618_v44 }
 0x479   : > { %v710_v47 = vpop.f32.mrf.mxu1 }
 0x47a   : > { %v711_v48 = vadd.f32 %v710_v47, %v633_v46 }
 0x47b   : > { %v712_v49 = vpop.f32.mrf.mxu1 }
 0x47c   : > { %v713_v50 = vadd.f32 %v712_v49, %v633_v46  ;;  %v720_v51 = vmul.f32 %v711_v48, %v711_v48  ;;  %v715_v52 = vsel %vm410_vm9, %v711_v48, 0.0 }
 0x47e   : > { %v716_v53 = vsel %vm410_vm9, %v713_v50, 0.0  ;;  %v721_v54 = vmul.f32 %v713_v50, %v713_v50  ;;  %v722_v56 = vsel %vm410_vm9, %v720_v51, 0.0 }
 0x47f   : > { %v717_v55 = vadd.f32 %v716_v53, %v715_v52 }
 0x480   : > { %v723_v57 = vsel %vm410_vm9, %v721_v54, 0.0 }
 0x481   : > { %718 = vadd.xlane.f32.xlu1 %v717_v55  ;;  %v724_v58 = vadd.f32 %v723_v57, %v722_v56 }
 0x483   : > { %725 = vadd.xlane.f32.xlu0 %v724_v58 }
 0x50a   : > { %v719_v59 = vpop.xlane.xlu1 %718 }
 0x50b   : > { %v727_v60 = vmul.f32 0.00390625, %v719_v59 }
 0x50c   : > { %v726_v61 = vpop.xlane.xlu0 %725 }
 0x50d   : > { %v728_v62 = vmul.f32 0.00390625, %v726_v61  ;;  %v729_v63 = vmul.f32 %v727_v60, %v727_v60  ;;  %v731_v11 = vsub.f32 %v711_v48, %v727_v60  ;;  %v732_v12 = vsub.f32 %v713_v50, %v727_v60 }
 0x50f   : > { %v730_v9 = vsub.f32 %v728_v62, %v729_v63 }
 0x511   : > { %v733_v10 = vadd.f32 1e-05, %v730_v9 }
 0x513   : > { %907 = vrsqrt.f32 %v733_v10 }
 0x520   : > { %v908_v2 = vpop.eup %907 }
 0x521   : > { %v735_v5 = vmul.f32 %v908_v2, %v731_v11  ;;  %v736_v6 = vmul.f32 %v908_v2, %v732_v12 }
 0x523   : > { %v737_v7 = vadd.f32 %v735_v5, %v1149_v0  ;;  %v738_v8 = vadd.f32 %v736_v6, %v1158_v1 }
 0x525   : > { %v741_v13 = vcombine.low %v737_v7, %v738_v8 }
 0x527   : > { %743 = vst [vmem:[%s240_s15] sm:$0xff] %v741_v13 }
 0x528   : > { %950 = shalt.err (!%p947_p10)
}
 0x529   : > { %s951_s8 = scalar_lea.hbm %s757_s16, 128  ;;  %s955_s9 = scalar_lea.hbm %s1399_s5, 256 }
 0x52a   : > { %p952_p2 = scmp.ne.s32.totalorder %s757_s16, %s951_s8  ;;  %p956_p7 = scmp.lt.s32.totalorder %s757_s16, %s1399_s5 }
 0x52b   : > { %p957_p0 = scmp.lt.s32.totalorder %s955_s9, %s951_s8 }
 0x52c   : > { %p953_p4 = pnand %p952_p2, %p1418_p12 }
 0x52d   : > { %p958_p6 = por %p957_p0, %p956_p7 }
 0x52e   : > { %p954_p9 = pneg %p953_p4 }
 0x530   : > { %p959_p11 = pnand %p958_p6, %p954_p9 }
 0x532   : > { %962 = shalt.err (!%p959_p11)
}
 0x533   : > { %853 = dma.vmem_to_hbm [thread:$0]  (%p1418_p12), %s760_s12, 128, %s757_s16, %s745_s25  }
 0x534 PF: > { %s771_s23 = sand.u32 1, %s989_s18   ;;  %p1419_p13 = scmp.ne.s32.totalorder %s1405_s6, 0 }
 0x535   : > { %p1420_p1 = scmp.ge.s32.totalorder %s1001_s21, 2  ;;  %s772_s15 = scalar_lea.sflag [#allocation5], %s771_s23 }
 0x537   : > { %p860_p3 = pnand %p1420_p1, %p1419_p13 }
 0x539   : > { %p861_p5 = pneg %p860_p3 }
 0x53b   : > { %984 = dma.done.wait (%p861_p5), %s772_s15, 128  }
 0x53c   : > { %986 = vsyncadd (%p861_p5), %s772_s15, 4294967168  ;;  %p18_p8 = scmp.ge.s32.totalorder %s1066_s24, 4   ;;  %s1421_s18 = smov %s993_s19 }
 0x53d   : > { %s1422_s19 = smov %s997_s20  ;;  %s1423_s20 = smov %s1078_s27 }
 0x53e   : > { %s1424_s21 = smov %s1066_s24  ;;  %20 = sbr.rel (!%p18_p8) target bundleno = 5 (0x5), region = 85 }
 0x543   :  { %777 = vsyncpa [#allocation4], 1 }
 0x544   :  { %779 = vsyncpa [#allocation4 + $0x1], 1 }
 0x545   :  { %780 = vsyncpa [#allocation5], 1 }
 0x546   :  { %782 = vsyncpa [#allocation5 + $0x1], 1 }

</bundles_post_ra>
